<compile_context>
chip_gen: v5e
topology: v5e:2x2
jax: 0.10.0
libtpu: 0.0.40
codegen_flags: <defaults>
</compile_context>

<pallas_src>
import functools
import math

import jax
import jax.numpy as jnp
from jax.experimental import pallas as pl
from jax.experimental.pallas import tpu as pltpu

# Matches the torch module's masked_fill value (-FLOAT32_MAX, not -inf): a fully
# masked row yields a uniform 1/Tk attention row instead of NaN.
FLOAT32_INF = float(jnp.finfo(jnp.float32).max)

_MIB = 1024 * 1024


def _make_sdpa_kernel(scale, mask_mode, return_attn):
    """mask_mode in {"none", "key", "full"}."""

    def kernel(*refs):
        q_ref, k_ref, v_ref = refs[0], refs[1], refs[2]
        nxt = 3
        mask_ref = None
        if mask_mode != "none":
            mask_ref = refs[3]
            nxt = 4
        out_ref = refs[nxt]
        attn_ref = refs[nxt + 1] if return_attn else None

        q = q_ref[...]  # [TQ, D]   (batch dim squeezed away by pl.Squeezed())
        k = k_ref[...]  # [Tk, D]
        v = v_ref[...]  # [Tk, Dv]

        # QK^T on the MXU: contract last dims directly (no transpose temp),
        # f32 accumulation regardless of operand dtype.  Scale applied to the
        # f32 scores (one VPU mul per element, hidden under the MXU).
        scores = jax.lax.dot_general(
            q, k,
            dimension_numbers=(((1,), (1,)), ((), ())),
            preferred_element_type=jnp.float32,
        ) * scale  # [TQ, Tk] f32

        if mask_mode != "none":
            # "key" mode: mask_ref is [1, Tk] and broadcasts over queries for free.
            scores = jnp.where(mask_ref[...] != 0, -FLOAT32_INF, scores)

        # Softmax over the key axis, f32 epilogue, exact divide (attn is exposed).
        m = jnp.max(scores, axis=-1, keepdims=True)
        e = jnp.exp(scores - m)
        denom = jnp.sum(e, axis=-1, keepdims=True)
        attn = e / denom

        # Dropout: eval-mode identity (see TODO at top).

        out = jnp.dot(attn.astype(v.dtype), v, preferred_element_type=jnp.float32)

        out_ref[...] = out.astype(out_ref.dtype)
        if return_attn:
            attn_ref[...] = attn.astype(attn_ref.dtype)

    return kernel


def _vmem_capacity_bytes():
    try:
        return int(pltpu.get_tpu_info().vmem_capacity_bytes)
    except Exception:
        return 64 * _MIB  # v7x per-core VMEM; conservative default


def _select_q_tile(Tq, Tk, D, Dv, in_isz, attn_isz, mask_mode, return_attn, budget):
    """Largest query tile (multiple of 128, or full Tq when small) that fits the budget."""

    def footprint(tq):
        fp = 2 * Tk * (D + Dv) * in_isz       # K + V (double-buffered by the pipeline)
        fp += 2 * tq * D * in_isz             # q tile
        fp += 2 * tq * Dv * in_isz            # out tile
        fp += 2 * tq * Tk * 4                 # scores + exp slabs (f32)
        if mask_mode == "full":
            fp += 2 * tq * Tk                 # int8 mask tile
        elif mask_mode == "key":
            fp += 2 * Tk
        if return_attn:
            fp += 2 * tq * Tk * attn_isz      # attn writeback tile
        return fp

    if Tq <= 128:
        tq = Tq                               # don't pad small Tq (v5e MXU note)
    else:
        tq = 128
        for cand in (512, 384, 256):
            if cand <= Tq and footprint(cand) <= budget:
                tq = cand
                break
    return tq, footprint(tq)


def scaled_dot_product_attention(q, k, v, attn_mask=None, d_model=None, *,
                                 return_attn=True, attn_dtype=None):
    """Scaled dot-product attention (forward, eval-mode dropout).

    q: [B,Tq,D], k: [B,Tk,D], v: [B,Tk,Dv].
    attn_mask: None, [B,Tk], [B,1,Tk] (key-padding, broadcast over queries) or
    [B,Tq,Tk]; nonzero/True = masked out.
    return_attn=False skips materializing the [B,Tq,Tk] attention matrix (the
    dominant HBM stream).  attn_dtype defaults to q.dtype; pass jnp.bfloat16 for
    f32 models to halve the attn writeback.
    For best v7x (2-TensorCore) utilization, flatten batch*heads into B so that
    B * num_q_blocks >= 2.
    """
    B, Tq, D = q.shape
    _, Tk, Dk = k.shape
    _, _, Dv = v.shape
    assert Dk == D and k.shape[0] == B and v.shape[0] == B and v.shape[1] == Tk

    if d_model is None:
        d_model = D
    scale = 1.0 / math.sqrt(float(d_model))
    if attn_dtype is None:
        attn_dtype = q.dtype

    # ---- mask normalization --------------------------------------------------
    operands = [q, k, v]
    if attn_mask is None:
        mask_mode = "none"
        mask_bytes = 0
    else:
        if attn_mask.ndim == 2:
            attn_mask = attn_mask.reshape(B, 1, Tk)
        assert attn_mask.ndim == 3 and attn_mask.shape[0] == B and attn_mask.shape[2] == Tk
        mask8 = attn_mask.astype(jnp.int8)
        if attn_mask.shape[1] == 1:
            mask_mode = "key"
            mask_bytes = B * Tk
        else:
            assert attn_mask.shape[1] == Tq
            mask_mode = "full"
            mask_bytes = B * Tq * Tk
        operands.append(mask8)

    # ---- tile / VMEM sizing ---------------------------------------------------
    in_isz = q.dtype.itemsize
    attn_isz = jnp.dtype(attn_dtype).itemsize
    vmem_cap = _vmem_capacity_bytes()
    budget = int(vmem_cap * 0.55)             # leave headroom for compiler scratch
    TQ, fp = _select_q_tile(Tq, Tk, D, Dv, in_isz, attn_isz, mask_mode, return_attn, budget)
    num_q_blocks = pl.cdiv(Tq, TQ)
    vmem_limit = int(max(32 * _MIB, min(int(vmem_cap * 0.9), int(fp * 1.5))))

    # ---- specs ----------------------------------------------------------------
    in_specs = [
        pl.BlockSpec((pl.Squeezed(), TQ, D), lambda b, i: (b, i, 0)),   # q tile
        pl.BlockSpec((pl.Squeezed(), Tk, D), lambda b, i: (b, 0, 0)),   # full K per batch
        pl.BlockSpec((pl.Squeezed(), Tk, Dv), lambda b, i: (b, 0, 0)),  # full V per batch
    ]
    if mask_mode == "full":
        in_specs.append(pl.BlockSpec((pl.Squeezed(), TQ, Tk), lambda b, i: (b, i, 0)))
    elif mask_mode == "key":
        in_specs.append(pl.BlockSpec((pl.Squeezed(), 1, Tk), lambda b, i: (b, 0, 0)))

    out_spec = pl.BlockSpec((pl.Squeezed(), TQ, Dv), lambda b, i: (b, i, 0))
    if return_attn:
        out_shape = (
            jax.ShapeDtypeStruct((B, Tq, Dv), q.dtype),
            jax.ShapeDtypeStruct((B, Tq, Tk), attn_dtype),
        )
        out_specs = [out_spec,
                     pl.BlockSpec((pl.Squeezed(), TQ, Tk), lambda b, i: (b, i, 0))]
    else:
        out_shape = jax.ShapeDtypeStruct((B, Tq, Dv), q.dtype)
        out_specs = out_spec

    bytes_accessed = (B * Tq * D + B * Tk * D + B * Tk * Dv + B * Tq * Dv) * in_isz
    bytes_accessed += mask_bytes
    if return_attn:
        bytes_accessed += B * Tq * Tk * attn_isz
    cost = pl.CostEstimate(flops=2 * B * Tq * Tk * (D + Dv),
                           transcendentals=B * Tq * Tk,
                           bytes_accessed=bytes_accessed)

    kernel = _make_sdpa_kernel(scale, mask_mode, return_attn)

    results = pl.pallas_call(
        kernel,
        out_shape=out_shape,
        grid=(B, num_q_blocks),
        in_specs=in_specs,
        out_specs=out_specs,
        compiler_params=pltpu.CompilerParams(
            dimension_semantics=("parallel", "parallel"),
            vmem_limit_bytes=vmem_limit,
        ),
        cost_estimate=cost,
    )(*operands)

    if return_attn:
        out, attn = results
        return out, attn
    return results


def _reference(q, k, v, attn_mask, d_model):
    temper = d_model ** 0.5
    scores = jnp.einsum("bqd,bkd->bqk", q, k) / temper
    if attn_mask is not None:
        scores = jnp.where(attn_mask, -FLOAT32_INF, scores)
    attn = jax.nn.softmax(scores, axis=-1)
    out = jnp.einsum("bqk,bkd->bqd", attn, v)
    return out, attn


if __name__ == "__main__":
    B, Tq, Tk, D, Dv = 2, 8, 8, 32, 32
    d_model = D

    key = jax.random.PRNGKey(0)
    kq, kk, kv_, km, kp = jax.random.split(key, 5)
    q = jax.random.normal(kq, (B, Tq, D), dtype=jnp.float32)
    k = jax.random.normal(kk, (B, Tk, D), dtype=jnp.float32)
    v = jax.random.normal(kv_, (B, Tk, Dv), dtype=jnp.float32)

    # 1) Full [B,Tq,Tk] bool mask (torch module contract), attn returned.
    full_mask = jax.random.bernoulli(km, p=0.3, shape=(B, Tq, Tk))
    full_mask = full_mask.at[:, :, 0].set(False)  # >=1 unmasked key per row

    out, attn = scaled_dot_product_attention(q, k, v, full_mask, d_model)
    out, attn = jax.block_until_ready((out, attn))
    ref_out, ref_attn = _reference(q, k, v, full_mask, d_model)
    assert jnp.allclose(out, ref_out, atol=2e-3, rtol=2e-3), "output mismatch (full mask)"
    assert jnp.allclose(attn, ref_attn, atol=2e-3, rtol=2e-3), "attn mismatch (full mask)"

    # 2) Key-padding mask [B,1,Tk], fast path without materializing attn.
    key_mask = jax.random.bernoulli(kp, p=0.3, shape=(B, 1, Tk))
    key_mask = key_mask.at[:, :, 0].set(False)
    out2 = scaled_dot_product_attention(q, k, v, key_mask, d_model, return_attn=False)
    out2 = jax.block_until_ready(out2)
    ref_out2, _ = _reference(q, k, v, key_mask, d_model)
    assert jnp.allclose(out2, ref_out2, atol=2e-3, rtol=2e-3), "output mismatch (key mask)"

    # 3) No mask, no attn output.
    out3 = scaled_dot_product_attention(q, k, v, None, d_model, return_attn=False)
    out3 = jax.block_until_ready(out3)
    ref_out3, _ = _reference(q, k, v, None, d_model)
    assert jnp.allclose(out3, ref_out3, atol=2e-3, rtol=2e-3), "output mismatch (no mask)"

    print("KERNEL_OK")
</pallas_src>

<mosaic_0001>
module attributes {stable_mosaic.version = 11 : i64} {
  func.func @kernel(%arg0: i32, %arg1: i32, %arg2: memref<1x8x32xf32, #tpu.memory_space<vmem>>, %arg3: memref<1x8x32xf32, #tpu.memory_space<vmem>>, %arg4: memref<1x8x32xf32, #tpu.memory_space<vmem>>, %arg5: memref<1x8x8xi8, #tpu.memory_space<vmem>>, %arg6: memref<1x8x32xf32, #tpu.memory_space<vmem>>, %arg7: memref<1x8x8xf32, #tpu.memory_space<vmem>>) attributes {dimension_semantics = [#tpu.dimension_semantics<parallel>, #tpu.dimension_semantics<parallel>], iteration_bounds = array<i64: 2, 1>, scalar_prefetch = 0 : i64, scratch_operands = 0 : i64, tpu.core_type = #tpu.core_type<tc>, window_params = [{transform_indices = @transform_0, window_bounds = array<i64: 1, 8, 32>}, {transform_indices = @transform_1, window_bounds = array<i64: 1, 8, 32>}, {transform_indices = @transform_2, window_bounds = array<i64: 1, 8, 32>}, {transform_indices = @transform_3, window_bounds = array<i64: 1, 8, 8>}, {transform_indices = @transform_4, window_bounds = array<i64: 1, 8, 32>}, {transform_indices = @transform_5, window_bounds = array<i64: 1, 8, 8>}]} {
    %c0 = arith.constant 0 : index
    %c0_0 = arith.constant 0 : index
    %c0_1 = arith.constant 0 : index
    %0 = vector.load %arg2[%c0, %c0_0, %c0_1] : memref<1x8x32xf32, #tpu.memory_space<vmem>>, vector<1x8x32xf32>
    %1 = vector.shape_cast %0 : vector<1x8x32xf32> to vector<8x32xf32>
    %c0_2 = arith.constant 0 : index
    %c0_3 = arith.constant 0 : index
    %c0_4 = arith.constant 0 : index
    %2 = vector.load %arg3[%c0_2, %c0_3, %c0_4] : memref<1x8x32xf32, #tpu.memory_space<vmem>>, vector<1x8x32xf32>
    %3 = vector.shape_cast %2 : vector<1x8x32xf32> to vector<8x32xf32>
    %c0_5 = arith.constant 0 : index
    %c0_6 = arith.constant 0 : index
    %c0_7 = arith.constant 0 : index
    %4 = vector.load %arg4[%c0_5, %c0_6, %c0_7] : memref<1x8x32xf32, #tpu.memory_space<vmem>>, vector<1x8x32xf32>
    %5 = vector.shape_cast %4 : vector<1x8x32xf32> to vector<8x32xf32>
    %cst = arith.constant dense<0.000000e+00> : vector<8x8xf32>
    %6 = tpu.matmul %1, %3, %cst {dimension_numbers = #tpu.dot_dimension_numbers<[1], [1], [0], [0], [0, 0, 1, 0], [], []>} : vector<8x32xf32>, vector<8x32xf32>, vector<8x8xf32> -> vector<8x8xf32>
    %cst_8 = arith.constant 0.176776692 : f32
    %7 = vector.broadcast %cst_8 : f32 to vector<8x8xf32>
    %8 = arith.mulf %6, %7 : vector<8x8xf32>
    %c0_9 = arith.constant 0 : index
    %c0_10 = arith.constant 0 : index
    %c0_11 = arith.constant 0 : index
    %9 = vector.load %arg5[%c0_9, %c0_10, %c0_11] : memref<1x8x8xi8, #tpu.memory_space<vmem>>, vector<1x8x8xi8>
    %10 = vector.shape_cast %9 : vector<1x8x8xi8> to vector<8x8xi8>
    %c0_i8 = arith.constant 0 : i8
    %11 = vector.broadcast %c0_i8 : i8 to vector<8x8xi8>
    %12 = arith.cmpi ne, %10, %11 : vector<8x8xi8>
    %cst_12 = arith.constant -3.40282347E+38 : f32
    %13 = vector.broadcast %cst_12 : f32 to vector<8x8xf32>
    %14 = arith.select %12, %13, %8 : vector<8x8xi1>, vector<8x8xf32>
    %cst_13 = arith.constant dense<0xFF800000> : vector<8xf32>
    %15 = vector.multi_reduction <maximumf>, %14, %cst_13 [1] : vector<8x8xf32> to vector<8xf32>
    %16 = vector.shape_cast %15 : vector<8xf32> to vector<8x1xf32>
    %17 = vector.broadcast %16 : vector<8x1xf32> to vector<8x8xf32>
    %18 = arith.subf %14, %17 : vector<8x8xf32>
    %19 = math.exp %18 : vector<8x8xf32>
    %cst_14 = arith.constant dense<0.000000e+00> : vector<8xf32>
    %20 = vector.multi_reduction <add>, %19, %cst_14 [1] : vector<8x8xf32> to vector<8xf32>
    %21 = vector.shape_cast %20 : vector<8xf32> to vector<8x1xf32>
    %22 = vector.broadcast %21 : vector<8x1xf32> to vector<8x8xf32>
    %23 = arith.divf %19, %22 : vector<8x8xf32>
    %cst_15 = arith.constant dense<0.000000e+00> : vector<8x32xf32>
    %24 = tpu.matmul %23, %5, %cst_15 {dimension_numbers = #tpu.dot_dimension_numbers<[1], [0], [0], [1], [0, 0, 1, 1], [], []>} : vector<8x8xf32>, vector<8x32xf32>, vector<8x32xf32> -> vector<8x32xf32>
    %c0_16 = arith.constant 0 : index
    %c0_17 = arith.constant 0 : index
    %c0_18 = arith.constant 0 : index
    %25 = vector.load %arg6[%c0_16, %c0_17, %c0_18] : memref<1x8x32xf32, #tpu.memory_space<vmem>>, vector<1x8x32xf32>
    %26 = vector.shape_cast %25 : vector<1x8x32xf32> to vector<8x32xf32>
    %27 = vector.shape_cast %24 : vector<8x32xf32> to vector<1x8x32xf32>
    tpu.vector_store %arg6[%c0_16, %c0_17, %c0_18], %27 {strides = array<i32>} : memref<1x8x32xf32, #tpu.memory_space<vmem>>, vector<1x8x32xf32>,
    %c0_19 = arith.constant 0 : index
    %c0_20 = arith.constant 0 : index
    %c0_21 = arith.constant 0 : index
    %28 = vector.load %arg7[%c0_19, %c0_20, %c0_21] : memref<1x8x8xf32, #tpu.memory_space<vmem>>, vector<1x8x8xf32>
    %29 = vector.shape_cast %28 : vector<1x8x8xf32> to vector<8x8xf32>
    %30 = vector.shape_cast %23 : vector<8x8xf32> to vector<1x8x8xf32>
    tpu.vector_store %arg7[%c0_19, %c0_20, %c0_21], %30 {strides = array<i32>} : memref<1x8x8xf32, #tpu.memory_space<vmem>>, vector<1x8x8xf32>,
    return
  }
  func.func @transform_0(%arg0: i32, %arg1: i32) -> (i32, i32, i32) {
    %c0_i32 = arith.constant 0 : i32
    %c0_i32_0 = arith.constant 0 : i32
    return %arg0, %arg1, %c0_i32 : i32, i32, i32
  }
  func.func @transform_1(%arg0: i32, %arg1: i32) -> (i32, i32, i32) {
    %c0_i32 = arith.constant 0 : i32
    %c0_i32_0 = arith.constant 0 : i32
    %c0_i32_1 = arith.constant 0 : i32
    return %arg0, %c0_i32, %c0_i32_0 : i32, i32, i32
  }
  func.func @transform_2(%arg0: i32, %arg1: i32) -> (i32, i32, i32) {
    %c0_i32 = arith.constant 0 : i32
    %c0_i32_0 = arith.constant 0 : i32
    %c0_i32_1 = arith.constant 0 : i32
    return %arg0, %c0_i32, %c0_i32_0 : i32, i32, i32
  }
  func.func @transform_3(%arg0: i32, %arg1: i32) -> (i32, i32, i32) {
    %c0_i32 = arith.constant 0 : i32
    %c0_i32_0 = arith.constant 0 : i32
    return %arg0, %arg1, %c0_i32 : i32, i32, i32
  }
  func.func @transform_4(%arg0: i32, %arg1: i32) -> (i32, i32, i32) {
    %c0_i32 = arith.constant 0 : i32
    %c0_i32_0 = arith.constant 0 : i32
    return %arg0, %arg1, %c0_i32 : i32, i32, i32
  }
  func.func @transform_5(%arg0: i32, %arg1: i32) -> (i32, i32, i32) {
    %c0_i32 = arith.constant 0 : i32
    %c0_i32_0 = arith.constant 0 : i32
    return %arg0, %arg1, %c0_i32 : i32, i32, i32
  }
}

</mosaic_0001>

<bundles_post_ra>
// kernel: tpu_custom_call.1
= control target key start
LH: loop header
LB: loop body
LE: loop exit
PB: predicated region body
PF: predicated region fallthrough
CT: control target
= control target key end

     0   :  { %s1284_s0 = inlined_call_operand.hbm [shape: f32[2,8,32], index: 0, kind: input, shape index: {}]   ;;  %s1285_s1 = inlined_call_operand.hbm [shape: f32[2,8,32], index: 1, kind: input, shape index: {}]   ;;  %s1286_s2 = inlined_call_operand.hbm [shape: f32[2,8,32], index: 2, kind: input, shape index: {}]   ;;  %s1287_s3 = inlined_call_operand.hbm [shape: s8[2,8,8], index: 3, kind: input, shape index: {}]   ;;  %s1288_s4 = inlined_call_operand.hbm [shape: f32[2,8,32], index: 4, kind: output, shape index: {0}]   ;;  %s1289_s5 = inlined_call_operand.hbm [shape: f32[2,8,8], index: 5, kind: output, shape index: {1}]  }
   0x1   :  { %1295 = sst [smem:[#allocation23_spill]] %s1284_s0 }
   0x2   :  { %1296 = sst [smem:[#allocation24_spill]] %s1285_s1 }
   0x3   :  { %11 = vsyncpa [#allocation3], 0 }
   0x4   :  { %13 = vsyncpa [#allocation3 + $0x1], 0 }
   0x5   :  { %14 = vsyncpa [#allocation6], 0 }
   0x6   :  { %16 = vsyncpa [#allocation6 + $0x1], 0 }
   0x7   :  { %17 = vsyncpa [#allocation9], 0 }
   0x8   :  { %19 = vsyncpa [#allocation9 + $0x1], 0 }
   0x9   :  { %20 = vsyncpa [#allocation4], 0 }
   0xa   :  { %22 = vsyncpa [#allocation4 + $0x1], 0 }
   0xb   :  { %23 = vsyncpa [#allocation12], 0 }
   0xc   :  { %25 = vsyncpa [#allocation12 + $0x1], 0  ;;  %s1086_s18 = smov 0   ;;  %s1088_s19 = smov 0  }
   0xd   :  { %s1090_s20 = smov 0   ;;  %s1092_s21 = smov 0  }
   0xe   :  { %s1094_s22 = smov 0   ;;  %s1096_s23 = smov 0  }
   0xf LB: > { %1297 = sst [smem:[#allocation18_spill]] %s1041_s20  ;;  %s1117_s24 = sadd.s32 4294967295, %s1053_s23   ;;  %s1053_s23 = sphi %s1096_s23, %s31_s23   ;;  %s1049_s22 = sphi %s1094_s22, %s1318_s22   ;;  %s1045_s21 = sphi %s1092_s21, %s1317_s21   ;;  %s1041_s20 = sphi %s1090_s20, %s1313_s20   ;;  %s1037_s19 = sphi %s1088_s19, %s1316_s19   ;;  %s1033_s18 = sphi %s1086_s18, %s1315_s18  }
  0x10   : > { %1298 = sst [smem:[#allocation19_spill]] %s1053_s23  ;;  %s697_s25 = sadd.s32 4294967294, %s1053_s23  }
  0x11   : > { %s43_s26 = sadd.s32 1, %s1049_s22  ;;  %s52_s27 = sadd.s32 1, %s1041_s20 }
  0x12   : > { %p45_p0 = scmp.ge.s32.totalorder %s43_s26, 2  ;;  %p59_p1 = scmp.ne.s32.totalorder %s1041_s20, %s1037_s19 }
  0x13   : > { %p60_p2 = scmp.eq.s32.totalorder %s1053_s23, 0  ;;  %p65_p3 = scmp.ne.s32.totalorder %s1037_s19, %s1033_s18 }
  0x14   : > { %s1320_s26 = smov (%p45_p0, %s43_s26), 0  ;;  %p66_p5 = scmp.eq.s32.totalorder %s1117_s24, 0 }
  0x15   : > { %1299 = sst [smem:[#allocation20_spill]] %s1320_s26  ;;  %p1129_p4 = por %p60_p2, %p59_p1 }
  0x16   : > { %s47_s29 = ssub.s32 %s1049_s22, %s1320_s26  ;;  %p171_p6 = scmp.eq.s32.totalorder %s1117_s24, 1 }
  0x17   : > { %p50_p7 = scmp.eq.s32.totalorder %s47_s29, 0  ;;  %p1137_p8 = por %p66_p5, %p65_p3 }
  0x18   : > { %p1141_p9 = por %p171_p6, %p59_p1  ;;  %p177_p10 = scmp.eq.s32.totalorder %s697_s25, 1 }
  0x19   : > { %s1146_s7 = scalar_select %p50_p7, %s1041_s20, %s52_s27  }
  0x1a   : > { %p1148_p11 = por %p177_p10, %p65_p3  ;;  %p699_p12 = scmp.ge.s32.totalorder %s1053_s23, 2 }
  0x1b   : > { %1303 = sst [smem:[#allocation21_spill]] %s1146_s7  ;;  %p756_p13 = scmp.lt.s32.totalorder %s1053_s23, 2 }
  0x1c   : > { %s1304_s8 = scalar_select %p1148_p11, 1, 0 }
  0x1d   : > { %s1155_s9 = sand.u32 1, %s1041_s20   ;;  %s701_s11 = sshll.u32 %s1049_s22, 3 }
  0x1e   : > { %1305 = sst [smem:[#allocation22_spill]] %s1304_s8  ;;  %s700_s10 = sshll.u32 %s1155_s9, 3 }
  0x1f   : > { %p1161_p0 = pnand %p756_p13, %p1129_p4  ;;  %s245_s13 = sand.u32 1, %s1053_s23  }
  0x20   : > { %s1307_s1 = sld [smem:[#allocation24_spill]]  ;;  %s249_s25 = scalar_lea.vmem [#allocation5], %s700_s10 }
  0x21   : > { %s257_s27 = sshll.u32 %s249_s25, 4  ;;  %s246_s29 = scalar_lea.sflag [#allocation6], %s245_s13  ;;  %s258_s27 = int_to_ptr.vmem [resolvable:$true] %s257_s27 }
  0x22   : > { %p708_p1 = scmp.ge.s32.totalorder %s1053_s23, 1  ;;  %p301_p2 = scmp.lt.s32.totalorder %s1053_s23, 3 }
  0x23   : > { %s1309_s0 = sld [smem:[#allocation23_spill]]  ;;  %s229_s25 = scalar_lea.vmem [#allocation2], %s700_s10 }
  0x24   : > { %p1173_p3 = pnand %p708_p1, %p301_p2  ;;  %s226_s13 = scalar_lea.sflag [#allocation3], %s1155_s9 }
  0x25   : > { %s272_s7 = scalar_lea.hbm %s1286_s2, %s701_s11  ;;  %s268_s23 = scalar_lea.vmem [#allocation7], %s700_s10 }
  0x26   : > { %s253_s16 = scalar_lea.hbm %s1307_s1, %s701_s11  ;;  %s238_s1 = sshll.u32 %s229_s25, 4  ;;  %s239_s1 = int_to_ptr.vmem [resolvable:$true] %s238_s1 }
  0x27   : > { %s255_s17 = sshll.u32 %s253_s16, 4  ;;  %s274_s20 = sshll.u32 %s272_s7, 4  ;;  %s256_s17 = int_to_ptr.hbm [resolvable:$true] %s255_s17  ;;  %s275_s20 = int_to_ptr.hbm [resolvable:$true] %s274_s20 }
  0x28   : > { %742 = dma.hbm_to_vmem [thread:$0]  (!%p1161_p0), %s256_s17, 128, %s258_s27, %s246_s29  }
  0x29   : > { %s234_s15 = scalar_lea.hbm %s1309_s0, %s701_s11  ;;  %s276_s26 = sshll.u32 %s268_s23, 4  ;;  %s277_s26 = int_to_ptr.vmem [resolvable:$true] %s276_s26 }
  0x2a   : > { %s236_s16 = sshll.u32 %s234_s15, 4  ;;  %s706_s14 = sshll.u32 %s1155_s9, 1  ;;  %s237_s16 = int_to_ptr.hbm [resolvable:$true] %s236_s16 }
  0x2b   : > { %739 = dma.hbm_to_vmem [thread:$0]  (!%p1161_p0), %s237_s16, 128, %s239_s1, %s226_s13  }
  0x2c   : > { %745 = dma.hbm_to_vmem [thread:$0]  (!%p1161_p0), %s275_s20, 128, %s277_s26, %s246_s29  }
  0x2d   : > { %s707_s15 = sshll.u32 %s1049_s22, 1  ;;  %s287_s1 = scalar_lea.vmem [#allocation8], %s706_s14 }
  0x2e   : > { %s292_s8 = scalar_lea.hbm %s1287_s3, %s707_s15  ;;  %s296_s16 = sshll.u32 %s287_s1, 4  ;;  %s297_s16 = int_to_ptr.vmem [resolvable:$true] %s296_s16 }
  0x2f   : > { %s294_s13 = sshll.u32 %s292_s8, 4  ;;  %s284_s11 = scalar_lea.sflag [#allocation9], %s1155_s9  ;;  %s295_s13 = int_to_ptr.hbm [resolvable:$true] %s294_s13 }
  0x30   : > { %748 = dma.hbm_to_vmem [thread:$0]  (!%p1161_p0), %s295_s13, 32, %s297_s16, %s284_s11  }
  0x31   : > { %305 = sbr.rel (%p1173_p3) target bundleno = 587 (0x24b), region = 36  ;;  %s1199_s20 = sand.u32 (!%p1173_p3), 1, %s1037_s19  }
  0x32   : > { %s1202_s23 = sshll.u32 (!%p1173_p3), %s1199_s20, 3  ;;  %s308_s0 = scalar_lea.sflag (!%p1173_p3), [#allocation3], %s1199_s20 }
  0x33   : > { %s311_s7 = scalar_lea.vmem (!%p1173_p3), [#allocation2], %s1202_s23 }
  0x36   : > { %1012 = dma.done.wait (%p1137_p8), %s308_s0, 128  }
  0x37   : > { %1014 = vsyncadd (%p1137_p8), %s308_s0, 4294967168  ;;  %s317_s8 = sand.u32 1, %s1117_s24   ;;  %s321_s10 = scalar_lea.vmem [#allocation5], %s1202_s23 }
  0x38   : > { %s318_s9 = scalar_lea.sflag [#allocation6], %s317_s8 }
  0x39   : > { %1016 = dma.done.wait (%p1137_p8), %s318_s9, 256  }
  0x3a   : > { %1018 = vsyncadd (%p1137_p8), %s318_s9, 4294967040  ;;  %s712_s12 = sshll.u32 %s1199_s20, 1  ;;  %s331_s29 = scalar_lea.vmem [#allocation7], %s1202_s23 }
  0x3b   : > { %s338_s28 = scalar_lea.sflag [#allocation9], %s1199_s20  ;;  %s341_s17 = scalar_lea.vmem [#allocation8], %s712_s12 }
  0x3c   : > { %1020 = dma.done.wait (%p1137_p8), %s338_s28, 32  }
  0x3d   : > { %1022 = vsyncadd (%p1137_p8), %s338_s28, 4294967264  ;;  %vm394_vm0 = vcmask 261120   ;;  %v392_v0 = vld [vmem:[%s321_s10] sm:$0xff]  ;;  %v391_v1 = vld [vmem:[%s311_s7] sm:$0xff]  ;;  %v1055_v3 = vmov 0   ;;  %vm428_vm3 = vcmask 64512  }
  0x3e   : > { %715 = vmatpush.xpose.msk.msra.mxu0 %vm394_vm0, %v392_v0  ;;  %v422_v2 = vld [vmem:[%s341_s17] sm:$0x3]  ;;  %v393_v15 = vld [vmem:[%s331_s29] sm:$0xff]  ;;  %s720_s24 = sshll.u32 %s1045_s21, 3  ;;  %s388_s14 = scalar_lea.vmem [#allocation11], %s1202_s23 }
  0x3f   : > { %vm423_vm1 = vnez %v422_v2  ;;  %471 = vmatpush.msra.mxu1 %v393_v15  ;;  %s510_s26 = scalar_lea.hbm %s1289_s5, %s720_s24  ;;  %s512_s15 = sshll.u32 %s388_s14, 4  ;;  %s513_s15 = int_to_ptr.vmem [resolvable:$true] %s512_s15 }
  0x40   : > { %v424_v4 = vsel %vm423_vm1, 16843009, %v1055_v3  ;;  %s514_s25 = sshll.u32 %s510_s26, 4  ;;  %s484_s1 = scalar_lea.sflag [#allocation12], %s1199_s20  ;;  %s515_s25 = int_to_ptr.hbm [resolvable:$true] %s514_s25 }
  0x41   : > { %716 = vmatmul.msk.f32.vlgmr.msra.gmra.mxu0 %vm394_vm0, %v391_v1  ;;  %v425_v5 = vunpack.c.0.s8 %v424_v4  ;;  %s945_s21 = sshra.s32 %s515_s25, 4  ;;  %s951_s0 = scalar_lea.hbm %s1289_s5, 16  ;;  %s946_s21 = int_to_ptr.hbm [resolvable:$true] %s945_s21 }
  0x42   : > { %s947_s16 = scalar_lea.hbm %s946_s21, 8  ;;  %p952_p7 = scmp.lt.s32.totalorder %s946_s21, %s1289_s5 }
  0x43   : > { %vm426_vm2 = vcmp.ne.s32.totalorder %v425_v5, 0  ;;  %p948_p4 = scmp.ne.s32.totalorder %s946_s21, %s947_s16  ;;  %p953_p8 = scmp.lt.s32.totalorder %s951_s0, %s947_s16 }
  0x45   : > { %p949_p5 = pnand %p948_p4, %p1141_p9  ;;  %p954_p10 = por %p953_p8, %p952_p7 }
  0x47   : > { %p950_p6 = pneg %p949_p5 }
  0x49   : > { %p955_p13 = pnand %p954_p10, %p950_p6 }
  0xbe   : > { %v418_v6 = vpop.f32.mrf.mxu0 }
  0xbf   : > { %v421_v7 = vmul.f32 0.17677669, %v418_v6 }
  0xc1   : > { %v427_v8 = vsel %vm426_vm2, -3.4028235e+38, %v421_v7 }
  0xc2   : > { %v429_v9 = vsel %vm428_vm3, %v427_v8, -inf }
  0xc3   : > { %430 = vmax.xlane.f32.xlu0 %v429_v9 }
 0x136   : > { %v431_v10 = vpop.xlane.xlu0 %430 }
 0x137   : > { %v432_v11 = vsub.f32 %v427_v8, %v431_v10 }
 0x139   : > { %v433_v12 = vmul.f32 1.442695, %v432_v11 }
 0x13b   : > { %807 = vpow2.f32 %v433_v12 }
 0x141   : > { %v808_v13 = vpop.eup %807 }
 0x142   : > { %v435_v14 = vsel %vm428_vm3, %v808_v13, 0.0 }
 0x143   : > { %436 = vadd.xlane.f32.xlu0 %v435_v14 }
 0x1b6   : > { %v437_v16 = vpop.xlane.xlu0 %436 }
 0x1b7   : > { %809 = vrcp.f32 %v437_v16  ;;  %v449_v20 = vand.u32 2147483648, %v437_v16  ;;  %v447_v22 = vand.u32 2147483647, %v437_v16  ;;  %vm443_vm5 = vweird.f32 %v437_v16 }
 0x1b9   : > { %v450_v24 = vor.u32 1.1754944e-38, %v449_v20  ;;  %vm448_vm7 = vcmp.eq.f32.partialorder %v447_v22, 8.507059e+37 }
 0x1bd   : > { %v810_v17 = vpop.eup %809 }
 0x1be   : > { %v439_v18 = vmul.f32 %v810_v17, %v437_v16  ;;  %vm444_vm4 = vweird.f32 %v810_v17 }
 0x1bf   : > { %vm445_vm6 = vmor %vm443_vm5, %vm444_vm4 }
 0x1c0   : > { %v440_v19 = vsub.f32 1.0, %v439_v18 }
 0x1c2   : > { %v441_v21 = vmul.f32 %v810_v17, %v440_v19 }
 0x1c4   : > { %v442_v23 = vadd.f32 %v810_v17, %v441_v21 }
 0x1c6   : > { %v446_v25 = vsel %vm445_vm6, %v810_v17, %v442_v23 }
 0x1c7   : > { %v451_v26 = vsel %vm448_vm7, %v450_v24, %v446_v25 }
 0x1c8   : > { %v452_v27 = vmul.f32 %v808_v13, %v451_v26 }
 0x1ca   : > { %717 = vmatmul.msk.f32.vlgmr.msra.gmra.mxu1 %vm428_vm3, %v452_v27  ;;  %477 = vst.msk [vmem:[%s388_s14] sm:$0xff] %vm428_vm3, %v452_v27 }
 0x1cb   : > { %958 = shalt.err (!%p955_p13)
}
 0x1cc   : > { %733 = dma.vmem_to_hbm [thread:$0]  (%p1141_p9), %s513_s15, 128, %s515_s25, %s484_s1  }
 0x1cd   : > { %s495_s12 = scalar_lea.hbm %s1288_s4, %s720_s24  ;;  %s381_s29 = scalar_lea.vmem [#allocation10], %s1202_s23 }
 0x1ce   : > { %s497_s28 = sshll.u32 %s381_s29, 4  ;;  %s499_s17 = sshll.u32 %s495_s12, 4  ;;  %s498_s28 = int_to_ptr.vmem [resolvable:$true] %s497_s28  ;;  %s500_s17 = int_to_ptr.hbm [resolvable:$true] %s499_s17 }
 0x1cf   : > { %s479_s30 = scalar_lea.sflag [#allocation4], %s1199_s20  ;;  %s973_s27 = sshra.s32 %s500_s17, 4  ;;  %s974_s27 = int_to_ptr.hbm [resolvable:$true] %s973_s27 }
 0x1d0   : > { %s975_s26 = scalar_lea.hbm %s974_s27, 8  ;;  %s979_s24 = scalar_lea.hbm %s1288_s4, 16 }
 0x1d1   : > { %p976_p0 = scmp.ne.s32.totalorder %s974_s27, %s975_s26  ;;  %p980_p3 = scmp.lt.s32.totalorder %s974_s27, %s1288_s4 }
 0x1d2   : > { %p981_p4 = scmp.lt.s32.totalorder %s979_s24, %s975_s26 }
 0x1d3   : > { %p977_p1 = pnand %p976_p0, %p1141_p9 }
 0x1d4   : > { %p982_p5 = por %p981_p4, %p980_p3 }
 0x1d5   : > { %p978_p2 = pneg %p977_p1 }
 0x1d7   : > { %p983_p6 = pnand %p982_p5, %p978_p2 }
 0x247   : > { %v473_v28 = vpop.f32.mrf.mxu1 }
 0x248   : > { %476 = vst.msk [vmem:[%s381_s29] sm:$0xff] %vm394_vm0, %v473_v28 }
 0x249   : > { %986 = shalt.err (!%p983_p6)
}
 0x24a   : > { %732 = dma.vmem_to_hbm [thread:$0]  (%p1141_p9), %s498_s28, 128, %s500_s17, %s479_s30  }
 0x24b PF: > { %s1311_s1 = sld [smem:[#allocation19_spill]]  ;;  %s526_s21 = sand.u32 1, %s1033_s18  }
 0x24c   : > { %p750_p7 = pnand %p699_p12, %p1148_p11  ;;  %s527_s16 = scalar_lea.sflag [#allocation4], %s526_s21 }
 0x24e   : > { %p751_p8 = pneg %p750_p7 }
 0x250   : > { %1024 = dma.done.wait (%p751_p8), %s527_s16, 128  }
 0x251   : > { %1026 = vsyncadd (%p751_p8), %s527_s16, 4294967168  ;;  %s537_s13 = scalar_lea.sflag [#allocation12], %s526_s21 }
 0x252   : > { %1028 = dma.done.wait (%p751_p8), %s537_s13, 128  }
 0x253   : > { %1030 = vsyncadd (%p751_p8), %s537_s13, 4294967168  ;;  %s31_s23 = sadd.s32 1, %s1311_s1   ;;  %s1312_s6 = sld [smem:[#allocation18_spill]] }
 0x254   : > { %p28_p10 = scmp.ge.s32.totalorder %s31_s23, 4   ;;  %s1313_s20 = sld [smem:[#allocation21_spill]] }
 0x255   : > { %s1314_s11 = sld [smem:[#allocation20_spill]]  ;;  %s1315_s18 = smov %s1037_s19 }
 0x256   : > { %s1317_s21 = smov %s1049_s22 }
 0x257   :  { %30 = sbr.rel (!%p28_p10) target bundleno = 15 (0xf), region = 135 }
 0x259   : > { %s1316_s19 = smov %s1312_s6 }
 0x25b   : > { %s1318_s22 = smov %s1314_s11 }
 0x25c   :  { %543 = vsyncpa [#allocation3], 1 }
 0x25d   :  { %545 = vsyncpa [#allocation3 + $0x1], 1 }
 0x25e   :  { %546 = vsyncpa [#allocation6], 1 }
 0x25f   :  { %548 = vsyncpa [#allocation6 + $0x1], 1 }
 0x260   :  { %549 = vsyncpa [#allocation9], 1 }
 0x261   :  { %551 = vsyncpa [#allocation9 + $0x1], 1 }
 0x262   :  { %552 = vsyncpa [#allocation4], 1 }
 0x263   :  { %554 = vsyncpa [#allocation4 + $0x1], 1 }
 0x264   :  { %555 = vsyncpa [#allocation12], 1 }
 0x265   :  { %557 = vsyncpa [#allocation12 + $0x1], 1 }

</bundles_post_ra>
